<compile_context>
chip_gen: v6e
topology: v6e:2x2x1
jax: 0.10.0
libtpu: 0.0.40
codegen_flags: <defaults>
</compile_context>

<pallas_src>
import math

import jax
import jax.numpy as jnp
from jax.experimental import pallas as pl
from jax.experimental.pallas import tpu as pltpu


def _round_up(a, b):
    return ((a + b - 1) // b) * b


def _round_down(a, b):
    return (a // b) * b


def _semb_kernel(x_ref, w_ref, b_ref, o_ref):
    # One MXU matmul per row tile (f32 accumulate); bias add in f32, then cast.
    y = jnp.dot(x_ref[...], w_ref[...], preferred_element_type=jnp.float32)
    o_ref[...] = (y + b_ref[...]).astype(o_ref.dtype)


def prepare_sembeddings_params(weight, bias, d_model, param_dtype=jnp.bfloat16):
    """One-time init-side prep: fold sqrt(d_model), pre-transpose, lane-pad d_model.

    weight: [d_model, dim] (PyTorch nn.Linear layout), bias: [d_model].
    Returns w_t_scaled [dim, d_model_padded] (param_dtype), b_scaled [1, d_model_padded] (f32).
    """
    scale = math.sqrt(d_model)
    d_model_p = _round_up(d_model, 128)
    w_t = (weight.astype(jnp.float32) * scale).T                    # [dim, d_model]
    b = (bias.astype(jnp.float32) * scale).reshape(1, d_model)      # [1, d_model]
    if d_model_p != d_model:
        w_t = jnp.pad(w_t, ((0, 0), (0, d_model_p - d_model)))
        b = jnp.pad(b, ((0, 0), (0, d_model_p - d_model)))
    return w_t.astype(param_dtype), b


def _vmem_capacity_bytes():
    try:
        return int(pltpu.get_tpu_info().vmem_capacity_bytes)
    except Exception:
        return 64 * 1024 * 1024  # conservative fallback (v7x per-core VMEM)


def sembeddings_forward(x, w_t_scaled, b_scaled, d_model=None, out_dtype=None):
    """x: [batch, seq, dim]; w_t_scaled: [dim, d_model_p]; b_scaled: [1, d_model_p]."""
    batch, seq, dim = x.shape
    d_model_p = w_t_scaled.shape[1]
    if d_model is None:
        d_model = d_model_p
    if out_dtype is None:
        out_dtype = x.dtype
    n = batch * seq
    x2d = x.reshape(n, dim)

    x_isz = jnp.dtype(x.dtype).itemsize
    w_isz = jnp.dtype(w_t_scaled.dtype).itemsize
    b_isz = jnp.dtype(b_scaled.dtype).itemsize
    o_isz = jnp.dtype(out_dtype).itemsize

    # Generation-aware VMEM budget: ~80% of physical (≈51 MiB v7x, ≈102 MiB v5e/v6e).
    vmem_budget = int(0.8 * _vmem_capacity_bytes())

    # Row-tile size from the budget: single-buffered resident params (Buffered(1)),
    # double-buffered streamed x/out tiles, small slack for compiler scratch.
    resident = dim * d_model_p * w_isz + d_model_p * b_isz
    per_row = dim * x_isz + d_model_p * o_isz
    tm_budget = max(8, (vmem_budget - resident - (2 << 20)) // (2 * per_row))
    # Keep >= 2 grid steps so dimension_semantics=("parallel",) can split across TCs.
    half_n = _round_up(pl.cdiv(n, 2), 8)
    tm = max(8, min(_round_down(tm_budget, 8), 4096, half_n))

    grid = (pl.cdiv(n, tm),)  # ragged last block: no input pad, masked output writeback

    cost = pl.CostEstimate(
        flops=2 * n * dim * d_model_p,
        transcendentals=0,
        bytes_accessed=(n * dim * x_isz + dim * d_model_p * w_isz
                        + d_model_p * b_isz + n * d_model_p * o_isz),
    )

    out2d = pl.pallas_call(
        _semb_kernel,
        out_shape=jax.ShapeDtypeStruct((n, d_model_p), out_dtype),
        grid_spec=pltpu.PrefetchScalarGridSpec(
            num_scalar_prefetch=0,
            grid=grid,
            in_specs=[
                # Streamed row tiles (double-buffered by default).
                pl.BlockSpec((tm, dim), lambda i: (i, 0)),
                # Resident weight / bias: constant index_map, single buffer.
                pl.BlockSpec((dim, d_model_p), lambda i: (0, 0),
                             pipeline_mode=pl.Buffered(1)),
                pl.BlockSpec((1, d_model_p), lambda i: (0, 0),
                             pipeline_mode=pl.Buffered(1)),
            ],
            out_specs=pl.BlockSpec((tm, d_model_p), lambda i: (i, 0)),
        ),
        compiler_params=pltpu.CompilerParams(
            dimension_semantics=("parallel",),
            vmem_limit_bytes=vmem_budget,
        ),
        cost_estimate=cost,
    )(x2d, w_t_scaled, b_scaled)

    if d_model_p != d_model:
        out2d = out2d[:, :d_model]
    return out2d.reshape(batch, seq, d_model)


if __name__ == "__main__":
    # Small shapes consistent with the module's forward: x [batch, seq, dim].
    batch, seq, dim, d_model = 2, 8, 32, 128

    key = jax.random.PRNGKey(0)
    kx, kw, kb = jax.random.split(key, 3)

    x = jax.random.normal(kx, (batch, seq, dim), dtype=jnp.float32)

    # Deterministic parameter init mirroring nn.Linear's default:
    # uniform(-1/sqrt(in_features), 1/sqrt(in_features)).
    bound = 1.0 / math.sqrt(dim)
    weight = jax.random.uniform(kw, (d_model, dim), minval=-bound, maxval=bound,
                                dtype=jnp.float32)
    bias = jax.random.uniform(kb, (d_model,), minval=-bound, maxval=bound,
                              dtype=jnp.float32)

    # One-time init-side prep (transpose + scale fold + bf16 weight).
    w_t_scaled, b_scaled = prepare_sembeddings_params(weight, bias, d_model)

    # Stream activations in bf16 (HBM-bound op); f32 MXU accumulate + f32 output.
    x_bf = x.astype(jnp.bfloat16)
    out = sembeddings_forward(x_bf, w_t_scaled, b_scaled, d_model=d_model,
                              out_dtype=jnp.float32)
    out = jax.block_until_ready(out)
    assert out.shape == (batch, seq, d_model)

    # Tight check: same bf16-rounded operands, f32 math (verifies the kernel itself).
    ref_bf = (jnp.einsum("bsd,dm->bsm",
                         x_bf.astype(jnp.float32),
                         w_t_scaled.astype(jnp.float32)[:, :d_model])
              + b_scaled[0, :d_model])
    assert jnp.allclose(out, ref_bf, atol=1e-3, rtol=1e-3)

    # Loose check against the exact f32 module semantics (bf16 streaming rounding only).
    ref_full = (jnp.einsum("bsd,md->bsm", x, weight) + bias) * math.sqrt(d_model)
    assert jnp.allclose(out, ref_full, atol=0.15, rtol=0.02)

    print("KERNEL_OK")
</pallas_src>

<mosaic_0001>
module attributes {stable_mosaic.version = 11 : i64} {
  func.func @_semb_kernel(%arg0: i32, %arg1: memref<8x32xbf16, #tpu.memory_space<vmem>>, %arg2: memref<32x128xbf16, #tpu.memory_space<vmem>>, %arg3: memref<1x128xf32, #tpu.memory_space<vmem>>, %arg4: memref<8x128xf32, #tpu.memory_space<vmem>>) attributes {dimension_semantics = [#tpu.dimension_semantics<parallel>], iteration_bounds = array<i64: 2>, scalar_prefetch = 0 : i64, scratch_operands = 0 : i64, tpu.core_type = #tpu.core_type<tc>, window_params = [{transform_indices = @transform_0, window_bounds = array<i64: 8, 32>}, {pipeline_mode = #tpu.pipeline_mode<synchronous>, transform_indices = @transform_1, window_bounds = array<i64: 32, 128>}, {pipeline_mode = #tpu.pipeline_mode<synchronous>, transform_indices = @transform_2, window_bounds = array<i64: 1, 128>}, {transform_indices = @transform_3, window_bounds = array<i64: 8, 128>}]} {
    %c0 = arith.constant 0 : index
    %c0_0 = arith.constant 0 : index
    %0 = vector.load %arg1[%c0, %c0_0] : memref<8x32xbf16, #tpu.memory_space<vmem>>, vector<8x32xbf16>
    %c0_1 = arith.constant 0 : index
    %c0_2 = arith.constant 0 : index
    %1 = vector.load %arg2[%c0_1, %c0_2] : memref<32x128xbf16, #tpu.memory_space<vmem>>, vector<32x128xbf16>
    %cst = arith.constant dense<0.000000e+00> : vector<8x128xf32>
    %2 = tpu.matmul %0, %1, %cst {dimension_numbers = #tpu.dot_dimension_numbers<[1], [0], [0], [1], [0, 0, 1, 1], [], []>} : vector<8x32xbf16>, vector<32x128xbf16>, vector<8x128xf32> -> vector<8x128xf32>
    %c0_3 = arith.constant 0 : index
    %c0_4 = arith.constant 0 : index
    %3 = vector.load %arg3[%c0_3, %c0_4] : memref<1x128xf32, #tpu.memory_space<vmem>>, vector<1x128xf32>
    %4 = vector.broadcast %3 : vector<1x128xf32> to vector<8x128xf32>
    %5 = arith.addf %2, %4 : vector<8x128xf32>
    %c0_5 = arith.constant 0 : index
    %c0_6 = arith.constant 0 : index
    %6 = vector.load %arg4[%c0_5, %c0_6] : memref<8x128xf32, #tpu.memory_space<vmem>>, vector<8x128xf32>
    tpu.vector_store %arg4[%c0_5, %c0_6], %5 {strides = array<i32>} : memref<8x128xf32, #tpu.memory_space<vmem>>, vector<8x128xf32>,
    return
  }
  func.func @transform_0(%arg0: i32) -> (i32, i32) {
    %c0_i32 = arith.constant 0 : i32
    %c0_i32_0 = arith.constant 0 : i32
    return %arg0, %c0_i32 : i32, i32
  }
  func.func @transform_1(%arg0: i32) -> (i32, i32) {
    %c0_i32 = arith.constant 0 : i32
    %c0_i32_0 = arith.constant 0 : i32
    %c0_i32_1 = arith.constant 0 : i32
    return %c0_i32, %c0_i32_0 : i32, i32
  }
  func.func @transform_2(%arg0: i32) -> (i32, i32) {
    %c0_i32 = arith.constant 0 : i32
    %c0_i32_0 = arith.constant 0 : i32
    %c0_i32_1 = arith.constant 0 : i32
    return %c0_i32, %c0_i32_0 : i32, i32
  }
  func.func @transform_3(%arg0: i32) -> (i32, i32) {
    %c0_i32 = arith.constant 0 : i32
    %c0_i32_0 = arith.constant 0 : i32
    return %arg0, %c0_i32 : i32, i32
  }
}

</mosaic_0001>

<bundles_post_ra>
// kernel: tpu_custom_call.1
= control target key start
LH: loop header
LB: loop body
LE: loop exit
PB: predicated region body
PF: predicated region fallthrough
CT: control target
= control target key end

     0   :  { %8 = vsyncpa [#allocation3], 0  ;;  %s778_s0 = inlined_call_operand.hbm [shape: bf16[16,32], index: 0, kind: input, shape index: {}]   ;;  %s779_s1 = inlined_call_operand.hbm [shape: bf16[32,128], index: 1, kind: input, shape index: {}]   ;;  %s780_s2 = inlined_call_operand.vmem [shape: f32[1,128], index: 2, kind: input, shape index: {}]   ;;  %s781_s3 = inlined_call_operand.hbm [shape: f32[16,128], index: 3, kind: output, shape index: {}]  }
   0x1   :  { %10 = vsyncpa [#allocation3 + $0x1], 0 }
   0x2   :  { %11 = vsyncpa [#allocation6], 0 }
   0x3   :  { %12 = vsyncpa [#allocation4], 0 }
   0x4   :  { %14 = vsyncpa [#allocation4 + $0x1], 0  ;;  %s608_s12 = smov 0   ;;  %s610_s13 = smov 0  }
   0x5   :  { %s612_s14 = smov 0   ;;  %s614_s15 = smov 0  }
   0x6 LB: > { %s629_s16 = sadd.s32 4294967295, %s579_s15   ;;  %s365_s17 = sadd.s32 4294967294, %s579_s15   ;;  %s579_s15 = sphi %s614_s15, %s803_s15   ;;  %s575_s14 = sphi %s612_s14, %s802_s14   ;;  %s571_s13 = sphi %s610_s13, %s801_s13   ;;  %s567_s12 = sphi %s608_s12, %s800_s12  }
   0x7   : > { %p40_p0 = scmp.ne.s32.totalorder %s571_s13, %s567_s12  ;;  %p782_p1 = scmp.eq.s32.totalorder %s629_s16, 0 }
   0x8   : > { %p112_p3 = scmp.eq.s32.totalorder %s365_s17, 1  ;;  %p366_p5 = scmp.ge.s32.totalorder %s579_s15, 1 }
   0x9   : > { %p638_p4 = por %p782_p1, %p40_p0  ;;  %p119_p7 = scmp.lt.s32.totalorder %s579_s15, 3 }
   0xa   : > { %p643_p6 = por %p112_p3, %p40_p0  ;;  %s581_s21 = smov [#allocation5]  }
   0xb   : > { %s786_s18 = scalar_select %p638_p4, 1, 0 }
   0xc   : > { %s787_s19 = scalar_select %p643_p6, 1, 0 }
   0xd   : > { %p648_p8 = pnand %p366_p5, %p119_p7  ;;  %s131_s22 = sshll.u32 %s581_s21, 4  ;;  %s132_s22 = int_to_ptr.vmem [resolvable:$true] %s131_s22 }
   0xe   : > { %s662_s24 = sadd.s32 1, %s579_s15   ;;  %s27_s25 = sadd.s32 1, %s575_s14 }
   0xf   : > { %s788_s20 = scalar_select %p648_p8, 1, 0 }
  0x10   : > { %p402_p9 = pneg %p648_p8  ;;  %s24_s26 = ssub.s32 %s579_s15, %s662_s24 }
  0x11   : > { %s468_s27 = scalar_lea.vmem %s132_s22, 256  ;;  %p476_p5 = scmp.lt.s32.totalorder %s132_s22, %s132_s22 }
  0x12   : > { %p657_p11 = pnand %p402_p9, %p782_p1  ;;  %p469_p13 = scmp.ne.s32.totalorder %s132_s22, %s468_s27 }
  0x13   : > { %p477_p7 = scmp.lt.s32.totalorder %s468_s27, %s468_s27 }
  0x14   : > { %p459_p12 = pneg %p657_p11 }
  0x15   : > { %p478_p10 = por %p477_p7, %p476_p5 }
  0x16   : > { %p471_p0 = pnand %p469_p13, %p459_p12 }
  0x18   : > { %p472_p3 = pneg %p471_p0 }
  0x1a   : > { %p479_p2 = pnand %p478_p10, %p472_p3 }
  0x1c   : > { %482 = shalt.err (!%p479_p2)
}
  0x1d   : > { %s582_s28 = smov 64   ;;  %s583_s29 = smov 4  }
  0x1e   : > { %405 = dma.hbm_to_vmem [thread:$0]  (!%p657_p11), %s779_s1, 256, %s132_s22, [#allocation6], %s582_s28, %s582_s28, %s583_s29  }
  0x1f   : > { %p25_p9 = scmp.eq.s32.totalorder %s24_s26, 0  ;;  %p34_p12 = scmp.ne.s32.totalorder %s575_s14, %s571_s13 }
  0x20   : > { %p35_p10 = scmp.eq.s32.totalorder %s579_s15, 0  ;;  %p415_p2 = scmp.lt.s32.totalorder %s579_s15, 2 }
  0x21   : > { %s679_s5 = scalar_select %p25_p9, %s575_s14, %s27_s25  }
  0x22   : > { %p36_p13 = por %p35_p10, %p34_p12  ;;  %p790_p0 = scmp.eq.s32.totalorder %s629_s16, 1 }
  0x23   : > { %s148_s7 = sand.u32 1, %s575_s14   ;;  %s370_s8 = sshll.u32 %s579_s15, 6 }
  0x24   : > { %p683_p3 = por %p790_p0, %p34_p12  ;;  %s369_s9 = sshll.u32 %s148_s7, 2 }
  0x25   : > { %s692_s17 = scalar_lea.hbm %s778_s0, %s370_s8  ;;  %s152_s21 = scalar_lea.vmem [#allocation2], %s369_s9 }
  0x26   : > { %s791_s6 = scalar_select %p683_p3, 1, 0 }
  0x27   : > { %s159_s22 = sshll.u32 %s152_s21, 4  ;;  %p694_p11 = pnand %p415_p2, %p36_p13  ;;  %s160_s22 = int_to_ptr.vmem [resolvable:$true] %s159_s22 }
  0x28   : > { %s149_s25 = scalar_lea.sflag [#allocation3], %s148_s7  ;;  %s483_s26 = scalar_lea.hbm %s692_s17, 64 }
  0x29   : > { %p484_p5 = scmp.ne.s32.totalorder %s692_s17, %s483_s26  ;;  %p485_p7 = pneg %p694_p11 }
  0x2a   : > { %s488_s29 = scalar_lea.hbm %s778_s0, 128  ;;  %p489_p10 = scmp.lt.s32.totalorder %s692_s17, %s778_s0 }
  0x2b   : > { %p486_p9 = pnand %p485_p7, %p484_p5  ;;  %p490_p2 = scmp.lt.s32.totalorder %s488_s29, %s483_s26 }
  0x2d   : > { %p487_p12 = pneg %p486_p9  ;;  %p491_p13 = por %p490_p2, %p489_p10 }
  0x2f   : > { %p492_p0 = pnand %p491_p13, %p487_p12 }
  0x31   : > { %495 = shalt.err (!%p492_p0)
}
  0x32   : > { %s496_s8 = scalar_lea.vmem %s160_s22, 64  ;;  %s584_s7 = smov [#allocation2]  }
  0x33   : > { %p497_p1 = scmp.ne.s32.totalorder %s160_s22, %s496_s8  ;;  %s501_s9 = sshll.u32 %s584_s7, 4  ;;  %s502_s9 = int_to_ptr.vmem [resolvable:$false] %s501_s9 }
  0x34   : > { %s503_s10 = scalar_lea.vmem %s502_s9, 128  ;;  %p504_p5 = scmp.lt.s32.totalorder %s160_s22, %s502_s9 }
  0x35   : > { %p499_p6 = pnand %p497_p1, %p485_p7  ;;  %p505_p9 = scmp.lt.s32.totalorder %s503_s10, %s496_s8 }
  0x37   : > { %p500_p3 = pneg %p499_p6  ;;  %p506_p4 = por %p505_p9, %p504_p5 }
  0x39   : > { %p507_p8 = pnand %p506_p4, %p500_p3 }
  0x3b   : > { %510 = shalt.err (!%p507_p8)
}
  0x3c   : > { %409 = dma.hbm_to_vmem [thread:$0]  (!%p694_p11), %s692_s17, 64, %s160_s22, %s149_s25  }
  0x3d   : > { %p793_p12 = scmp.ne.s32.totalorder %s788_s20, 0 }
  0x3e   : > { %s715_s11 = sand.u32 (!%p793_p12), 1, %s571_s13   ;;  %p794_p1 = scmp.ne.s32.totalorder (!%p793_p12), %s786_s18, 0 }
  0x3f   : > { %168 = sbr.rel (%p793_p12) target bundleno = 290 (0x122), region = 32  ;;  %s372_s21 = sshll.u32 (!%p793_p12), %s715_s11, 2 }
  0x40   : > { %s171_s26 = scalar_lea.sflag (!%p793_p12), [#allocation3], %s715_s11  ;;  %s174_s27 = scalar_lea.vmem (!%p793_p12), [#allocation2], %s372_s21 }
  0x44   : > { %554 = dma.done.wait (%p794_p1), %s171_s26, 64  }
  0x45   : > { %556 = vsyncadd (%p794_p1), %s171_s26, 4294967232  ;;  %p795_p4 = scmp.eq.s32.totalorder %s629_s16, 0 }
  0x47   : > { %558 = dma.done.wait (%p795_p4), [#allocation6], 256   ;;  %p796_p6 = pmov %p795_p4 }
  0x48   : > { %v585_v0 = vmov 0.0   ;;  %vm586_vm0 = vmmov 0   ;;  %v455_v1 = vld [vmem:[#allocation5 + $0x8] sm:$0xff]   ;;  %v456_v2 = vld [vmem:[#allocation5] sm:$0xff]   ;;  %v202_v3 = vld [vmem:[%s174_s27] sm:$0xf] }
  0x49   : > { %560 = vsyncadd (%p796_p6), [#allocation6], 4294967040  ;;  %386 = vmatprep.subr.bf16.mxu0 %v585_v0  ;;  %390 = vmatprep.mubr.msk.bf16.mxu0 %vm586_vm0, %v585_v0  ;;  %vm226_vm1 = vcmask 261120   ;;  %s374_s18 = sshll.u32 %s715_s11, 3  ;;  %v375_v4 = vld [vmem:[%s780_s2] ss:$0 sm:$0xff] }
  0x4a   : > { %387 = vmatpush3.bf16.msra.mxu0 %v455_v1  ;;  %s380_s22 = sshll.u32 %s629_s16, 7  ;;  %s200_s23 = scalar_lea.vmem [#allocation7], %s374_s18 }
  0x4b   : > { %388 = vmatprep.subr.bf16.mxu0 %v585_v0  ;;  %s285_s25 = sshll.u32 %s200_s23, 4  ;;  %s735_s30 = scalar_lea.hbm %s781_s3, %s380_s22  ;;  %s737_s25 = int_to_ptr.vmem [resolvable:$true] %s285_s25 }
  0x4c   : > { %s272_s4 = scalar_lea.sflag [#allocation4], %s715_s11  ;;  %s511_s8 = scalar_lea.vmem %s737_s25, 128 }
  0x4d   : > { %p512_p8 = scmp.ne.s32.totalorder %s737_s25, %s511_s8  ;;  %p797_p3 = scmp.ne.s32.totalorder %s791_s6, 0 }
  0x4e   : > { %389 = vmatpush3.bf16.msra.mxu0 %v456_v2  ;;  %s587_s16 = smov [#allocation7]  }
  0x4f   : > { %p513_p11 = pnand %p512_p8, %p797_p3  ;;  %s515_s7 = sshll.u32 %s587_s16, 4  ;;  %s516_s7 = int_to_ptr.vmem [resolvable:$false] %s515_s7 }
  0x50   : > { %s517_s9 = scalar_lea.vmem %s516_s7, 256  ;;  %p518_p10 = scmp.lt.s32.totalorder %s737_s25, %s516_s7 }
  0x51   : > { %391 = vmatmul.mubr.msk.bf16.vlgmr.msra.gmra.mxu0 %vm226_vm1, %v202_v3  ;;  %p514_p7 = pneg %p513_p11  ;;  %p519_p2 = scmp.lt.s32.totalorder %s517_s9, %s511_s8 }
  0x53   : > { %p520_p13 = por %p519_p2, %p518_p10 }
  0x55   : > { %p521_p0 = pnand %p520_p13, %p514_p7 }
 0x111   : > { %v264_v5 = vpop.f32.mrf.mxu0 }
 0x112   : > { %v265_v6 = vadd.f32 %v375_v4, %v264_v5 }
 0x113   : > { %v392_v7 = vpop.f32.mrf.mxu0 }
 0x114   : > { %270 = vst [vmem:[%s200_s23] sm:$0xff] %v265_v6 }
 0x115   : > { %v267_v8 = vpop.f32.mrf.mxu0 }
 0x116   : > { %524 = shalt.err (!%p521_p0)
}
 0x117   : > { %s525_s10 = scalar_lea.hbm %s735_s30, 128  ;;  %s529_s26 = scalar_lea.hbm %s781_s3, 256 }
 0x118   : > { %p526_p5 = scmp.ne.s32.totalorder %s735_s30, %s525_s10  ;;  %p530_p1 = scmp.lt.s32.totalorder %s735_s30, %s781_s3 }
 0x119   : > { %p531_p4 = scmp.lt.s32.totalorder %s529_s26, %s525_s10 }
 0x11a   : > { %p527_p9 = pnand %p526_p5, %p797_p3 }
 0x11b   : > { %p532_p6 = por %p531_p4, %p530_p1 }
 0x11c   : > { %p528_p12 = pneg %p527_p9 }
 0x11e   : > { %p533_p8 = pnand %p532_p6, %p528_p12 }
 0x120   : > { %536 = shalt.err (!%p533_p8)
}
 0x121   : > { %400 = dma.vmem_to_hbm [thread:$0]  (%p797_p3), %s737_s25, 128, %s735_s30, %s272_s4   ;;  %v393_v9 = vpop.f32.mrf.mxu0 }
 0x122 PF: > { %s297_s20 = sand.u32 1, %s567_s12   ;;  %p798_p11 = scmp.ne.s32.totalorder %s787_s19, 0 }
 0x123   : > { %p799_p7 = scmp.ge.s32.totalorder %s579_s15, 2  ;;  %s298_s17 = scalar_lea.sflag [#allocation4], %s297_s20 }
 0x125   : > { %p411_p10 = pnand %p799_p7, %p798_p11 }
 0x127   : > { %p412_p2 = pneg %p411_p10 }
 0x129   : > { %562 = dma.done.wait (%p412_p2), %s298_s17, 128  }
 0x12a   : > { %564 = vsyncadd (%p412_p2), %s298_s17, 4294967168  ;;  %p17_p13 = scmp.ge.s32.totalorder %s662_s24, 4   ;;  %s800_s12 = smov %s571_s13 }
 0x12b   : > { %s801_s13 = smov %s575_s14  ;;  %s802_s14 = smov %s679_s5 }
 0x12c   : > { %s803_s15 = smov %s662_s24  ;;  %19 = sbr.rel (!%p17_p13) target bundleno = 6 (0x6), region = 81 }
 0x131   :  { %303 = vsyncpa [#allocation3], 1 }
 0x132   :  { %305 = vsyncpa [#allocation3 + $0x1], 1 }
 0x133   :  { %306 = vsyncpa [#allocation6], 1 }
 0x134   :  { %307 = vsyncpa [#allocation4], 1 }
 0x135   :  { %309 = vsyncpa [#allocation4 + $0x1], 1 }

</bundles_post_ra>
